<compile_context>
chip_gen: v7x
topology: tpu7x:2x2x1
jax: 0.10.0
libtpu: 0.0.40
codegen_flags: <defaults>
</compile_context>

<pallas_src>
import functools

import numpy as np

import jax
import jax.numpy as jnp
from jax.experimental import pallas as pl
from jax.experimental.pallas import tpu as pltpu


def _round_up(n, m):
    return ((n + m - 1) // m) * m


def mdn_kernel(x_ref, w1_ref, b1_ref, w2_ref, b2_ref,
               eL_ref, eR_ref, red_ref, out_ref,
               *, num_gaussians, out_features):
    G, O = num_gaussians, out_features
    GOO, GO = G * O * O, G * O

    x = x_ref[...]

    # Fused first layer: one (TB, Din) x (Din, 3H) matmul + single ReLU pass.
    h = jnp.maximum(
        jnp.dot(x, w1_ref[...], preferred_element_type=jnp.float32) + b1_ref[...],
        0.0)

    # Fused block-diagonal second layer -> one contiguous (TB, OUT_PAD) slab:
    # columns [0:G] pi logits, [G:G+GOO] sigma, [G+GOO:G+GOO+GO] mu, rest zero.
    lin = jnp.dot(h, w2_ref[...], preferred_element_type=jnp.float32) + b2_ref[...]

    logits = lin[:, 0:G]
    sig = lin[:, G:G + GOO]
    mu = lin[:, G + GOO:G + GOO + GO]

    # pi = softmax(logits, dim=1); denominator via EUP approximate reciprocal.
    m = jnp.max(logits, axis=-1, keepdims=True)
    e = jnp.exp(logits - m)
    pi = e * pl.reciprocal(jnp.sum(e, axis=-1, keepdims=True), approx=True)

    # sigma_inv[b,g,i,k] = sum_j sig[b,g,i,j] * sig[b,g,k,j]
    # Vectorized: expand sig twice with constant one-hot matrices (MXU),
    # multiply elementwise (VPU), reduce over j with a one-hot matmul (MXU).
    a = jnp.dot(sig, eL_ref[...], preferred_element_type=jnp.float32)      # (TB, G*O^3)
    b = jnp.dot(sig, eR_ref[...], preferred_element_type=jnp.float32)      # (TB, G*O^3)
    sigma_inv = jnp.dot(a * b, red_ref[...],
                        preferred_element_type=jnp.float32)                # (TB, G*O^2)

    # Single lane-dense store of the whole output slab.
    parts = [pi, sigma_inv, mu]
    pad_lanes = out_ref.shape[-1] - (G + GOO + GO)
    if pad_lanes > 0:
        parts.append(jnp.zeros((x.shape[0], pad_lanes), jnp.float32))
    out_ref[...] = jnp.concatenate(parts, axis=-1)


def mdn_forward(x, params, *, num_gaussians, out_features, block_b=256):
    B, Din = x.shape
    G, O = num_gaussians, out_features
    GOO, GO, GOOO = G * O * O, G * O, G * O * O * O
    (w1p, b1p, wp, bp, w1s, b1s, ws, bs, w1m, b1m, wm, bm) = params
    H = w1p.shape[1]

    # ---- fuse the three first-layer weights: (Din, 3H), (1, 3H) ----
    w1 = jnp.concatenate([w1p, w1s, w1m], axis=1)
    b1 = jnp.concatenate([b1p, b1s, b1m], axis=1)

    # ---- fuse the three second layers into a block-diagonal, lane-padded W2 ----
    total_out = G + GOO + GO
    OUT_PAD = _round_up(total_out, 128)
    w2 = jnp.zeros((3 * H, OUT_PAD), jnp.float32)
    w2 = w2.at[0 * H:1 * H, 0:G].set(wp)
    w2 = w2.at[1 * H:2 * H, G:G + GOO].set(ws)
    w2 = w2.at[2 * H:3 * H, G + GOO:total_out].set(wm)
    b2 = jnp.zeros((1, OUT_PAD), jnp.float32)
    b2 = b2.at[:, 0:G].set(bp)
    b2 = b2.at[:, G:G + GOO].set(bs)
    b2 = b2.at[:, G + GOO:total_out].set(bm)

    # ---- constant one-hot matrices for vectorized sigma @ sigma^T ----
    # column index of the expanded tensor: (g, i, k, j)
    eL_np = np.zeros((GOO, GOOO), np.float32)
    eR_np = np.zeros((GOO, GOOO), np.float32)
    red_np = np.zeros((GOOO, GOO), np.float32)
    for g in range(G):
        for i in range(O):
            for k in range(O):
                for j in range(O):
                    col = ((g * O + i) * O + k) * O + j
                    eL_np[g * O * O + i * O + j, col] = 1.0
                    eR_np[g * O * O + k * O + j, col] = 1.0
                    red_np[col, g * O * O + i * O + k] = 1.0
    eL, eR, red = jnp.asarray(eL_np), jnp.asarray(eR_np), jnp.asarray(red_np)

    # ---- batch tiling: fixed tile (<= block_b), pad batch, pipeline over grid ----
    TB = min(block_b, max(8, _round_up(B, 8)))
    Bp = _round_up(B, TB)
    if Bp != B:
        x = jnp.pad(x, ((0, Bp - B), (0, 0)))
    nb = Bp // TB

    def full(shape):
        return pl.BlockSpec(shape, lambda i: (0, 0))

    kernel = functools.partial(mdn_kernel, num_gaussians=G, out_features=O)

    flops = (2 * Bp * (Din * 3 * H + 3 * H * OUT_PAD + 2 * GOO * GOOO + GOOO * GOO)
             + Bp * (GOOO + 4 * G))
    bytes_accessed = 4 * (Bp * Din + Bp * OUT_PAD
                          + w1.size + b1.size + w2.size + b2.size
                          + eL.size + eR.size + red.size)
    cost = pl.CostEstimate(flops=flops,
                           transcendentals=Bp * (G + 1),
                           bytes_accessed=bytes_accessed)

    out = pl.pallas_call(
        kernel,
        grid=(nb,),
        in_specs=[
            pl.BlockSpec((TB, Din), lambda i: (i, 0)),
            full((Din, 3 * H)), full((1, 3 * H)),
            full((3 * H, OUT_PAD)), full((1, OUT_PAD)),
            full((GOO, GOOO)), full((GOO, GOOO)), full((GOOO, GOO)),
        ],
        out_specs=pl.BlockSpec((TB, OUT_PAD), lambda i: (i, 0)),
        out_shape=jax.ShapeDtypeStruct((Bp, OUT_PAD), jnp.float32),
        compiler_params=pltpu.CompilerParams(dimension_semantics=("parallel",)),
        cost_estimate=cost,
    )(x, w1, b1, w2, b2, eL, eR, red)

    out = out[:B]
    pi = out[:, 0:G]
    sigma_inv = out[:, G:G + GOO].reshape(B, G, O, O)
    mu = out[:, G + GOO:G + GOO + GO].reshape(B, G, O)
    return pi, sigma_inv, mu


def init_linear(key, fan_in, fan_out):
    """nn.Linear default init, weight pre-transposed to (in, out)."""
    kw, kb = jax.random.split(key)
    bound = 1.0 / float(jnp.sqrt(jnp.float32(fan_in)))
    w = jax.random.uniform(kw, (fan_in, fan_out), jnp.float32, -bound, bound)
    b = jax.random.uniform(kb, (1, fan_out), jnp.float32, -bound, bound)
    return w, b


def ref_forward(x, params, G, O):
    """Plain-JAX reference mirroring the torch forward (for a sanity check)."""
    (w1p, b1p, wp, bp, w1s, b1s, ws, bs, w1m, b1m, wm, bm) = params
    hp = jax.lax.Precision.HIGHEST
    relu = lambda z: jnp.maximum(z, 0.0)
    mm = lambda a, b: jnp.dot(a, b, precision=hp)
    pi = jax.nn.softmax(mm(relu(mm(x, w1p) + b1p), wp) + bp, axis=1)
    mu = (mm(relu(mm(x, w1m) + b1m), wm) + bm).reshape(-1, G, O)
    sig = (mm(relu(mm(x, w1s) + b1s), ws) + bs).reshape(-1, G, O, O)
    sigma_inv = jnp.einsum('bgij,bgkj->bgik', sig, sig, precision=hp)
    return pi, sigma_inv, mu


if __name__ == "__main__":
    # flags.linear = [32, 64, 4], flags.num_gaussian = 4
    D_IN, HIDDEN, O = 32, 64, 4
    G = 4
    B = 8

    key = jax.random.PRNGKey(0)
    kx, k1, k2, k3, k4, k5, k6 = jax.random.split(key, 7)

    x = jax.random.normal(kx, (B, D_IN), jnp.float32)

    w1p, b1p = init_linear(k1, D_IN, HIDDEN)
    wp, bp = init_linear(k2, HIDDEN, G)
    w1s, b1s = init_linear(k3, D_IN, HIDDEN)
    ws, bs = init_linear(k4, HIDDEN, O * O * G)
    w1m, b1m = init_linear(k5, D_IN, HIDDEN)
    wm, bm = init_linear(k6, HIDDEN, O * G)
    params = (w1p, b1p, wp, bp, w1s, b1s, ws, bs, w1m, b1m, wm, bm)

    pi, sigma_inv, mu = mdn_forward(x, params, num_gaussians=G, out_features=O)
    jax.block_until_ready((pi, sigma_inv, mu))

    # sanity check against plain JAX reference
    pi_r, sigma_inv_r, mu_r = ref_forward(x, params, G, O)
    assert pi.shape == (B, G) and sigma_inv.shape == (B, G, O, O) and mu.shape == (B, G, O)
    # pi uses an approximate (EUP) reciprocal in the softmax denominator.
    assert jnp.allclose(pi, pi_r, rtol=2e-3, atol=2e-3)
    assert jnp.allclose(sigma_inv, sigma_inv_r, rtol=1e-4, atol=1e-4)
    assert jnp.allclose(mu, mu_r, rtol=1e-4, atol=1e-4)

    print("KERNEL_OK")
</pallas_src>

<mosaic_0001>
module attributes {stable_mosaic.version = 11 : i64} {
  func.func @mdn_kernel(%arg0: i32, %arg1: memref<8x32xf32, #tpu.memory_space<vmem>>, %arg2: memref<32x192xf32, #tpu.memory_space<vmem>>, %arg3: memref<1x192xf32, #tpu.memory_space<vmem>>, %arg4: memref<192x128xf32, #tpu.memory_space<vmem>>, %arg5: memref<1x128xf32, #tpu.memory_space<vmem>>, %arg6: memref<64x256xf32, #tpu.memory_space<vmem>>, %arg7: memref<64x256xf32, #tpu.memory_space<vmem>>, %arg8: memref<256x64xf32, #tpu.memory_space<vmem>>, %arg9: memref<8x128xf32, #tpu.memory_space<vmem>>) attributes {dimension_semantics = [#tpu.dimension_semantics<parallel>], iteration_bounds = array<i64: 1>, scalar_prefetch = 0 : i64, scratch_operands = 0 : i64, tpu.core_type = #tpu.core_type<tc>, window_params = [{transform_indices = @transform_0, window_bounds = array<i64: 8, 32>}, {pipeline_mode = #tpu.pipeline_mode<synchronous>, transform_indices = @transform_1, window_bounds = array<i64: 32, 192>}, {pipeline_mode = #tpu.pipeline_mode<synchronous>, transform_indices = @transform_2, window_bounds = array<i64: 1, 192>}, {pipeline_mode = #tpu.pipeline_mode<synchronous>, transform_indices = @transform_3, window_bounds = array<i64: 192, 128>}, {pipeline_mode = #tpu.pipeline_mode<synchronous>, transform_indices = @transform_4, window_bounds = array<i64: 1, 128>}, {pipeline_mode = #tpu.pipeline_mode<synchronous>, transform_indices = @transform_5, window_bounds = array<i64: 64, 256>}, {pipeline_mode = #tpu.pipeline_mode<synchronous>, transform_indices = @transform_6, window_bounds = array<i64: 64, 256>}, {pipeline_mode = #tpu.pipeline_mode<synchronous>, transform_indices = @transform_7, window_bounds = array<i64: 256, 64>}, {transform_indices = @transform_8, window_bounds = array<i64: 8, 128>}]} {
    %c0 = arith.constant 0 : index
    %c0_0 = arith.constant 0 : index
    %0 = vector.load %arg1[%c0, %c0_0] : memref<8x32xf32, #tpu.memory_space<vmem>>, vector<8x32xf32>
    %c0_1 = arith.constant 0 : index
    %c0_2 = arith.constant 0 : index
    %1 = vector.load %arg2[%c0_1, %c0_2] : memref<32x192xf32, #tpu.memory_space<vmem>>, vector<32x192xf32>
    %cst = arith.constant dense<0.000000e+00> : vector<8x192xf32>
    %2 = tpu.matmul %0, %1, %cst {dimension_numbers = #tpu.dot_dimension_numbers<[1], [0], [0], [1], [0, 0, 1, 1], [], []>} : vector<8x32xf32>, vector<32x192xf32>, vector<8x192xf32> -> vector<8x192xf32>
    %c0_3 = arith.constant 0 : index
    %c0_4 = arith.constant 0 : index
    %3 = vector.load %arg3[%c0_3, %c0_4] : memref<1x192xf32, #tpu.memory_space<vmem>>, vector<1x192xf32>
    %4 = vector.broadcast %3 : vector<1x192xf32> to vector<8x192xf32>
    %5 = arith.addf %2, %4 : vector<8x192xf32>
    %cst_5 = arith.constant 0.000000e+00 : f32
    %6 = vector.broadcast %cst_5 : f32 to vector<8x192xf32>
    %7 = arith.maximumf %5, %6 : vector<8x192xf32>
    %c0_6 = arith.constant 0 : index
    %c0_7 = arith.constant 0 : index
    %8 = vector.load %arg4[%c0_6, %c0_7] : memref<192x128xf32, #tpu.memory_space<vmem>>, vector<192x128xf32>
    %cst_8 = arith.constant dense<0.000000e+00> : vector<8x128xf32>
    %9 = tpu.matmul %7, %8, %cst_8 {dimension_numbers = #tpu.dot_dimension_numbers<[1], [0], [0], [1], [0, 0, 1, 1], [], []>} : vector<8x192xf32>, vector<192x128xf32>, vector<8x128xf32> -> vector<8x128xf32>
    %c0_9 = arith.constant 0 : index
    %c0_10 = arith.constant 0 : index
    %10 = vector.load %arg5[%c0_9, %c0_10] : memref<1x128xf32, #tpu.memory_space<vmem>>, vector<1x128xf32>
    %11 = vector.broadcast %10 : vector<1x128xf32> to vector<8x128xf32>
    %12 = arith.addf %9, %11 : vector<8x128xf32>
    %13 = vector.extract_strided_slice %12 {offsets = [0, 0], sizes = [8, 4], strides = [1, 1]} : vector<8x128xf32> to vector<8x4xf32>
    %14 = vector.extract_strided_slice %12 {offsets = [0, 4], sizes = [8, 64], strides = [1, 1]} : vector<8x128xf32> to vector<8x64xf32>
    %15 = vector.extract_strided_slice %12 {offsets = [0, 68], sizes = [8, 16], strides = [1, 1]} : vector<8x128xf32> to vector<8x16xf32>
    %cst_11 = arith.constant dense<0xFF800000> : vector<8xf32>
    %16 = vector.multi_reduction <maximumf>, %13, %cst_11 [1] : vector<8x4xf32> to vector<8xf32>
    %17 = vector.shape_cast %16 : vector<8xf32> to vector<8x1xf32>
    %18 = vector.broadcast %17 : vector<8x1xf32> to vector<8x4xf32>
    %19 = arith.subf %13, %18 : vector<8x4xf32>
    %20 = math.exp %19 : vector<8x4xf32>
    %cst_12 = arith.constant dense<0.000000e+00> : vector<8xf32>
    %21 = vector.multi_reduction <add>, %20, %cst_12 [1] : vector<8x4xf32> to vector<8xf32>
    %22 = vector.shape_cast %21 : vector<8xf32> to vector<8x1xf32>
    %23 = tpu.reciprocal %22 {approx = true} : vector<8x1xf32> -> vector<8x1xf32>
    %24 = vector.broadcast %23 : vector<8x1xf32> to vector<8x4xf32>
    %25 = arith.mulf %20, %24 : vector<8x4xf32>
    %c0_13 = arith.constant 0 : index
    %c0_14 = arith.constant 0 : index
    %26 = vector.load %arg6[%c0_13, %c0_14] : memref<64x256xf32, #tpu.memory_space<vmem>>, vector<64x256xf32>
    %cst_15 = arith.constant dense<0.000000e+00> : vector<8x256xf32>
    %27 = tpu.matmul %14, %26, %cst_15 {dimension_numbers = #tpu.dot_dimension_numbers<[1], [0], [0], [1], [0, 0, 1, 1], [], []>} : vector<8x64xf32>, vector<64x256xf32>, vector<8x256xf32> -> vector<8x256xf32>
    %c0_16 = arith.constant 0 : index
    %c0_17 = arith.constant 0 : index
    %28 = vector.load %arg7[%c0_16, %c0_17] : memref<64x256xf32, #tpu.memory_space<vmem>>, vector<64x256xf32>
    %cst_18 = arith.constant dense<0.000000e+00> : vector<8x256xf32>
    %29 = tpu.matmul %14, %28, %cst_18 {dimension_numbers = #tpu.dot_dimension_numbers<[1], [0], [0], [1], [0, 0, 1, 1], [], []>} : vector<8x64xf32>, vector<64x256xf32>, vector<8x256xf32> -> vector<8x256xf32>
    %30 = arith.mulf %27, %29 : vector<8x256xf32>
    %c0_19 = arith.constant 0 : index
    %c0_20 = arith.constant 0 : index
    %31 = vector.load %arg8[%c0_19, %c0_20] : memref<256x64xf32, #tpu.memory_space<vmem>>, vector<256x64xf32>
    %cst_21 = arith.constant dense<0.000000e+00> : vector<8x64xf32>
    %32 = tpu.matmul %30, %31, %cst_21 {dimension_numbers = #tpu.dot_dimension_numbers<[1], [0], [0], [1], [0, 0, 1, 1], [], []>} : vector<8x256xf32>, vector<256x64xf32>, vector<8x64xf32> -> vector<8x64xf32>
    %cst_22 = arith.constant 0.000000e+00 : f32
    %33 = vector.broadcast %cst_22 : f32 to vector<8x44xf32>
    %34 = tpu.concatenate %25, %32, %15, %33 in 1 : vector<8x4xf32>, vector<8x64xf32>, vector<8x16xf32>, vector<8x44xf32> -> vector<8x128xf32>
    %c0_23 = arith.constant 0 : index
    %c0_24 = arith.constant 0 : index
    %35 = vector.load %arg9[%c0_23, %c0_24] : memref<8x128xf32, #tpu.memory_space<vmem>>, vector<8x128xf32>
    tpu.vector_store %arg9[%c0_23, %c0_24], %34 {strides = array<i32>} : memref<8x128xf32, #tpu.memory_space<vmem>>, vector<8x128xf32>,
    return
  }
  func.func @transform_0(%arg0: i32) -> (i32, i32) {
    %c0_i32 = arith.constant 0 : i32
    %c0_i32_0 = arith.constant 0 : i32
    return %arg0, %c0_i32 : i32, i32
  }
  func.func @transform_1(%arg0: i32) -> (i32, i32) {
    %c0_i32 = arith.constant 0 : i32
    %c0_i32_0 = arith.constant 0 : i32
    %c0_i32_1 = arith.constant 0 : i32
    return %c0_i32, %c0_i32_0 : i32, i32
  }
  func.func @transform_2(%arg0: i32) -> (i32, i32) {
    %c0_i32 = arith.constant 0 : i32
    %c0_i32_0 = arith.constant 0 : i32
    %c0_i32_1 = arith.constant 0 : i32
    return %c0_i32, %c0_i32_0 : i32, i32
  }
  func.func @transform_3(%arg0: i32) -> (i32, i32) {
    %c0_i32 = arith.constant 0 : i32
    %c0_i32_0 = arith.constant 0 : i32
    %c0_i32_1 = arith.constant 0 : i32
    return %c0_i32, %c0_i32_0 : i32, i32
  }
  func.func @transform_4(%arg0: i32) -> (i32, i32) {
    %c0_i32 = arith.constant 0 : i32
    %c0_i32_0 = arith.constant 0 : i32
    %c0_i32_1 = arith.constant 0 : i32
    return %c0_i32, %c0_i32_0 : i32, i32
  }
  func.func @transform_5(%arg0: i32) -> (i32, i32) {
    %c0_i32 = arith.constant 0 : i32
    %c0_i32_0 = arith.constant 0 : i32
    %c0_i32_1 = arith.constant 0 : i32
    return %c0_i32, %c0_i32_0 : i32, i32
  }
  func.func @transform_6(%arg0: i32) -> (i32, i32) {
    %c0_i32 = arith.constant 0 : i32
    %c0_i32_0 = arith.constant 0 : i32
    %c0_i32_1 = arith.constant 0 : i32
    return %c0_i32, %c0_i32_0 : i32, i32
  }
  func.func @transform_7(%arg0: i32) -> (i32, i32) {
    %c0_i32 = arith.constant 0 : i32
    %c0_i32_0 = arith.constant 0 : i32
    %c0_i32_1 = arith.constant 0 : i32
    return %c0_i32, %c0_i32_0 : i32, i32
  }
  func.func @transform_8(%arg0: i32) -> (i32, i32) {
    %c0_i32 = arith.constant 0 : i32
    %c0_i32_0 = arith.constant 0 : i32
    return %arg0, %c0_i32 : i32, i32
  }
}

</mosaic_0001>

<bundles_post_ra>
// kernel: tpu_custom_call.1
= control target key start
LH: loop header
LB: loop body
LE: loop exit
PB: predicated region body
PF: predicated region fallthrough
CT: control target
= control target key end

     0   :  { %13 = vsyncpa [#allocation3], 0  ;;  %s1171_s0 = inlined_call_operand.hbm [shape: f32[8,32], index: 0, kind: input, shape index: {}]   ;;  %s1172_s1 = inlined_call_operand.vmem [shape: f32[32,192], index: 1, kind: input, shape index: {}]   ;;  %s1173_s2 = inlined_call_operand.vmem [shape: f32[1,192], index: 2, kind: input, shape index: {}]   ;;  %s1174_s3 = inlined_call_operand.vmem [shape: f32[192,128], index: 3, kind: input, shape index: {}]   ;;  %s1175_s4 = inlined_call_operand.vmem [shape: f32[1,128], index: 4, kind: input, shape index: {}]   ;;  %s1176_s5 = inlined_call_operand.vmem [shape: f32[64,256], index: 5, kind: input, shape index: {}]   ;;  %s1177_s6 = inlined_call_operand.hbm [shape: f32[64,256], index: 6, kind: input, shape index: {}]   ;;  %s1178_s7 = inlined_call_operand.vmem [shape: f32[256,64], index: 7, kind: input, shape index: {}]   ;;  %s1179_s8 = inlined_call_operand.hbm [shape: f32[8,128], index: 8, kind: output, shape index: {}]  }
   0x1   :  { %14 = vsyncpa [#allocation6], 0 }
   0x2   :  { %15 = vsyncpa [#allocation4], 0  ;;  %s813_s27 = smov [#allocation2]   ;;  %s814_s29 = smov [#allocation5]  }
   0x3   :  { %s22_s28 = sshll.u32 %s813_s27, 4  ;;  %s41_s30 = sshll.u32 %s814_s29, 4  ;;  %s23_s28 = int_to_ptr.vmem [resolvable:$true] %s22_s28  ;;  %s867_s30 = int_to_ptr.vmem [resolvable:$true] %s41_s30 }
   0x4   :  { %s741_s11 = scalar_lea.hbm %s1171_s0, 128 }
   0x5   :  { %p742_p0 = scmp.ne.s32.totalorder %s1171_s0, %s741_s11  ;;  %p745_p1 = scmp.lt.u32.totalorder %s741_s11, %s1171_s0 }
   0x7   :  { %p747_p2 = pnand %p745_p1, %p742_p0 }
   0x9   :  { %750 = shalt.err (!%p747_p2)
}
   0xa   :  { %s751_s16 = scalar_lea.vmem %s23_s28, 128  ;;  %p756_p4 = scmp.lt.s32.totalorder %s23_s28, %s23_s28 }
   0xb   :  { %p752_p3 = scmp.ne.s32.totalorder %s23_s28, %s751_s16  ;;  %p757_p5 = scmp.lt.s32.totalorder %s751_s16, %s751_s16 }
   0xd   :  { %p758_p6 = por %p757_p5, %p756_p4 }
   0xf   :  { %p759_p7 = pnand %p758_p6, %p752_p3 }
  0x11   :  { %762 = shalt.err (!%p759_p7)
}
  0x12   :  { %25 = dma.hbm_to_vmem [thread:$0]  %s1171_s0, 128, %s23_s28, [#allocation3]  }
  0x13   :  { %s763_s21 = scalar_lea.hbm %s1177_s6, 2048 }
  0x14   :  { %p764_p8 = scmp.ne.s32.totalorder %s1177_s6, %s763_s21  ;;  %p767_p9 = scmp.lt.u32.totalorder %s763_s21, %s1177_s6 }
  0x16   :  { %p769_p10 = pnand %p767_p9, %p764_p8 }
  0x18   :  { %772 = shalt.err (!%p769_p10)
}
  0x19   :  { %s773_s26 = scalar_lea.vmem %s867_s30, 2048  ;;  %p778_p12 = scmp.lt.s32.totalorder %s867_s30, %s867_s30 }
  0x1a   :  { %p774_p11 = scmp.ne.s32.totalorder %s867_s30, %s773_s26  ;;  %p779_p13 = scmp.lt.s32.totalorder %s773_s26, %s773_s26 }
  0x1c   :  { %p780_p0 = por %p779_p13, %p778_p12 }
  0x1e   :  { %p781_p1 = pnand %p780_p0, %p774_p11 }
  0x20   :  { %784 = shalt.err (!%p781_p1)
}
  0x21   :  { %s815_s0 = smov 256   ;;  %s816_s27 = smov 16  }
  0x22   :  { %47 = dma.hbm_to_vmem [thread:$0]  %s1177_s6, 2048, %s867_s30, [#allocation6], %s815_s0, %s815_s0, %s816_s27  }
  0x23   :  { %807 = dma.done.wait [#allocation3], 128  }
  0x24   :  { %808 = vsyncadd [#allocation3], 4294967168 }
  0x25   :  { %809 = dma.done.wait [#allocation6], 2048  }
  0x26   :  { %810 = vsyncadd [#allocation6], 4294965248  ;;  %v817_v0 = vmov 0.0   ;;  %v58_v1 = vld [vmem:[%s1172_s1 + $0x8] sm:$0xff]  ;;  %v60_v2 = vld [vmem:[%s1172_s1 + $0x18] sm:$0xff]  ;;  %vm77_vm0 = vcmask 261120   ;;  %v67_v51 = vlaneseq }
  0x27   :  { %145 = vmatprep.mubr.f32.mxu1 %v817_v0  ;;  %356 = vmatprep.mubr.f32.mxu0 %v817_v0  ;;  %v57_v3 = vld [vmem:[%s1172_s1] sm:$0xff]  ;;  %v620_v4 = vpack.c.bf16 %v60_v2, %v58_v1  ;;  %v59_v5 = vld [vmem:[%s1172_s1 + $0x10] sm:$0xff]  ;;  %v62_v6 = vld [vmem:[%s1172_s1 + $0x28] sm:$0xff]  ;;  %v818_v17 = vmov 0.0|0.0   ;;  %vm185_vm1 = vcmask 523264   ;;  %vm259_vm2 = vcmask 31744  }
  0x28   :  { %v64_v7 = vld [vmem:[%s1172_s1 + $0x38] sm:$0xff]  ;;  %v622_v8 = vpack.c.bf16 %v59_v5, %v57_v3  ;;  %v61_v10 = vld [vmem:[%s1172_s1 + $0x20] sm:$0xff]  ;;  %v63_v11 = vld [vmem:[%s1172_s1 + $0x30] sm:$0xff]  ;;  %v68_v52 = vshrl.u32 %v67_v51, 7  ;;  %s819_s1 = smov 124   ;;  %s820_s10 = smov 4  }
  0x29   :  { %v624_v9 = vpack.c.bf16 %v64_v7, %v62_v6  ;;  %621 = vmatprep.subr.bf16.mxu1 %v620_v4  ;;  %v626_v12 = vpack.c.bf16 %v63_v11, %v61_v10  ;;  %v154_v13 = vld [vmem:[%s1174_s3] sm:$0xff]  ;;  %v155_v14 = vld [vmem:[%s1174_s3 + $0x8] sm:$0xff]  ;;  %v156_v18 = vld [vmem:[%s1174_s3 + $0x10] sm:$0xff]  ;;  %vm559_vm3 = vcmask 556032   ;;  %vm561_vm4 = vcmask 687104  }
  0x2a   :  { %623 = vmatpush1.bf16.msra.mxu1 %v622_v8  ;;  %v56_v15 = vld [vmem:[#allocation2] sm:$0xff]  ;;  %v629_v16 = vpack.c.bf16 %v155_v14, %v154_v13  ;;  %v157_v19 = vld [vmem:[%s1174_s3 + $0x18] sm:$0xff]  ;;  %v159_v22 = vld [vmem:[%s1174_s3 + $0x28] sm:$0xff]  ;;  %v69_v53 = vsub.s32 0, %v68_v52  ;;  %v73_v55 = vsub.s32 1, %v68_v52 }
  0x2b   :  { %625 = vmatprep.subr.bf16.mxu1 %v624_v9  ;;  %v632_v20 = vpack.c.bf16 %v157_v19, %v156_v18  ;;  %v158_v21 = vld [vmem:[%s1174_s3 + $0x20] sm:$0xff]  ;;  %v160_v24 = vld [vmem:[%s1174_s3 + $0x30] sm:$0xff]  ;;  %v161_v25 = vld [vmem:[%s1174_s3 + $0x38] sm:$0xff] }
  0x2c   :  { %v635_v23 = vpack.c.bf16 %v159_v22, %v158_v21  ;;  %v638_v26 = vpack.c.bf16 %v161_v25, %v160_v24  ;;  %v162_v27 = vld [vmem:[%s1174_s3 + $0x40] sm:$0xff]  ;;  %v163_v28 = vld [vmem:[%s1174_s3 + $0x48] sm:$0xff]  ;;  %v164_v30 = vld [vmem:[%s1174_s3 + $0x50] sm:$0xff] }
  0x2d   :  { %v641_v29 = vpack.c.bf16 %v163_v28, %v162_v27  ;;  %v165_v31 = vld [vmem:[%s1174_s3 + $0x58] sm:$0xff]  ;;  %v166_v33 = vld [vmem:[%s1174_s3 + $0x60] sm:$0xff]  ;;  %v167_v34 = vld [vmem:[%s1174_s3 + $0x68] sm:$0xff] }
  0x2e   :  { %627 = vmatpush1.bf16.msra.mxu1 %v626_v12  ;;  %v644_v32 = vpack.c.bf16 %v165_v31, %v164_v30  ;;  %v647_v35 = vpack.c.bf16 %v167_v34, %v166_v33  ;;  %v168_v36 = vld [vmem:[%s1174_s3 + $0x70] sm:$0xff]  ;;  %v169_v37 = vld [vmem:[%s1174_s3 + $0x78] sm:$0xff]  ;;  %v170_v39 = vld [vmem:[%s1174_s3 + $0x80] sm:$0xff] }
  0x2f   :  { %628 = vmatprep.subr.bf16.mxu1 %v818_v17  ;;  %v650_v38 = vpack.c.bf16 %v169_v37, %v168_v36  ;;  %v171_v40 = vld [vmem:[%s1174_s3 + $0x88] sm:$0xff]  ;;  %v172_v42 = vld [vmem:[%s1174_s3 + $0x90] sm:$0xff]  ;;  %v173_v43 = vld [vmem:[%s1174_s3 + $0x98] sm:$0xff] }
  0x30   :  { %v653_v41 = vpack.c.bf16 %v171_v40, %v170_v39  ;;  %v656_v44 = vpack.c.bf16 %v173_v43, %v172_v42  ;;  %v174_v45 = vld [vmem:[%s1174_s3 + $0xa0] sm:$0xff]  ;;  %v175_v46 = vld [vmem:[%s1174_s3 + $0xa8] sm:$0xff]  ;;  %v176_v48 = vld [vmem:[%s1174_s3 + $0xb0] sm:$0xff] }
  0x31   :  { %580 = vmatmul.mubr.msk.f32.vlgmr.msra.gmra.mrb[0].mxu1 %vm77_vm0, %v56_v15  ;;  %v659_v47 = vpack.c.bf16 %v175_v46, %v174_v45  ;;  %v177_v49 = vld [vmem:[%s1174_s3 + $0xb8] sm:$0xff]  ;;  %v65_v54 = vld [vmem:[%s1173_s2] sm:$0x3]  ;;  %v272_v1 = vld [vmem:[%s1176_s5 + $0x8] sm:$0xff] }
  0x32   :  { %630 = vmatpush1.bf16.msra.mxu1 %v629_v16  ;;  %v662_v50 = vpack.c.bf16 %v177_v49, %v176_v48  ;;  %v70_v56 = vrot.slane %v65_v54, %v69_v53  ;;  %v74_v57 = vrot.slane %v65_v54, %v73_v55  ;;  %v274_v2 = vld [vmem:[%s1176_s5 + $0x18] sm:$0xff]  ;;  %v271_v3 = vld [vmem:[%s1176_s5] sm:$0xff]  ;;  %v273_v5 = vld [vmem:[%s1176_s5 + $0x10] sm:$0xff] }
  0x33   :  { %631 = vmatprep.subr.bf16.mxu1 %v818_v17  ;;  %v664_v4 = vpack.c.bf16 %v274_v2, %v272_v1  ;;  %v276_v6 = vld [vmem:[%s1176_s5 + $0x28] sm:$0xff]  ;;  %v278_v7 = vld [vmem:[%s1176_s5 + $0x38] sm:$0xff]  ;;  %v666_v8 = vpack.c.bf16 %v273_v5, %v271_v3  ;;  %v275_v10 = vld [vmem:[%s1176_s5 + $0x20] sm:$0xff] }
  0x34   :  { %v668_v9 = vpack.c.bf16 %v278_v7, %v276_v6  ;;  %v277_v11 = vld [vmem:[%s1176_s5 + $0x30] sm:$0xff]  ;;  %v280_v12 = vld [vmem:[%s1176_s5 + $0x48] sm:$0xff]  ;;  %v282_v13 = vld [vmem:[%s1176_s5 + $0x58] sm:$0xff] }
  0x35   :  { %665 = vmatprep.subr.bf16.mxu0 %v664_v4  ;;  %v670_v14 = vpack.c.bf16 %v277_v11, %v275_v10  ;;  %v672_v15 = vpack.c.bf16 %v282_v13, %v280_v12  ;;  %v279_v16 = vld [vmem:[%s1176_s5 + $0x40] sm:$0xff]  ;;  %v284_v18 = vld [vmem:[%s1176_s5 + $0x68] sm:$0xff]  ;;  %v286_v19 = vld [vmem:[%s1176_s5 + $0x78] sm:$0xff] }
  0x36   :  { %633 = vmatpush1.bf16.msra.mxu1 %v632_v20  ;;  %667 = vmatpush1.bf16.msra.mxu0 %v666_v8  ;;  %v676_v21 = vpack.c.bf16 %v286_v19, %v284_v18  ;;  %v283_v22 = vld [vmem:[%s1176_s5 + $0x60] sm:$0xff]  ;;  %v364_v24 = vld [vmem:[#allocation5 + $0x8] sm:$0xff]  ;;  %v363_v33 = vld [vmem:[#allocation5] sm:$0xff] }
  0x37   :  { %634 = vmatprep.subr.bf16.mxu1 %v818_v17  ;;  %669 = vmatprep.subr.bf16.mxu0 %v668_v9  ;;  %v366_v25 = vld [vmem:[#allocation5 + $0x18] sm:$0xff]  ;;  %v365_v34 = vld [vmem:[#allocation5 + $0x10] sm:$0xff]  ;;  %v367_v39 = vld [vmem:[#allocation5 + $0x20] sm:$0xff] }
  0x38   :  { %v680_v27 = vpack.c.bf16 %v366_v25, %v364_v24  ;;  %v581_v28 = vld [vmem:[%s1175_s4] ss:$0 sm:$0xff]  ;;  %v682_v37 = vpack.c.bf16 %v365_v34, %v363_v33  ;;  %v369_v40 = vld [vmem:[#allocation5 + $0x30] sm:$0xff]  ;;  %v372_v42 = vld [vmem:[#allocation5 + $0x48] sm:$0xff] }
  0x39   :  { %v370_v36 = vld [vmem:[#allocation5 + $0x38] sm:$0xff]  ;;  %v371_v46 = vld [vmem:[#allocation5 + $0x40] sm:$0xff]  ;;  %v376_v48 = vld [vmem:[#allocation5 + $0x68] sm:$0xff] }
  0x3a   :  { %636 = vmatpush1.bf16.msra.mxu1 %v635_v23  ;;  %671 = vmatpush1.bf16.msra.mxu0 %v670_v14  ;;  %v285_v23 = vld [vmem:[%s1176_s5 + $0x70] sm:$0xff]  ;;  %v374_v43 = vld [vmem:[#allocation5 + $0x58] sm:$0xff]  ;;  %v375_v52 = vld [vmem:[#allocation5 + $0x60] sm:$0xff] }
  0x3b   :  { %637 = vmatprep.subr.bf16.mxu1 %v818_v17  ;;  %673 = vmatprep.subr.bf16.mxu0 %v672_v15  ;;  %v688_v45 = vpack.c.bf16 %v374_v43, %v372_v42  ;;  %v378_v49 = vld [vmem:[#allocation5 + $0x78] sm:$0xff]  ;;  %v377_v53 = vld [vmem:[#allocation5 + $0x70] sm:$0xff]  ;;  %v473_v3 = vld [vmem:[%s1178_s7 + $0xa8] sm:$0xff] }
  0x3c   :  { %v692_v51 = vpack.c.bf16 %v378_v49, %v376_v48  ;;  %v468_v54 = vld [vmem:[%s1178_s7 + $0x80] sm:$0xff]  ;;  %v694_v55 = vpack.c.bf16 %v377_v53, %v375_v52  ;;  %v455_v1 = vld [vmem:[%s1178_s7 + $0x18] sm:$0xff]  ;;  %v457_v7 = vld [vmem:[%s1178_s7 + $0x28] sm:$0xff] }
  0x3d   :  { %v472_v2 = vld [vmem:[%s1178_s7 + $0xa0] sm:$0xff]  ;;  %v474_v14 = vld [vmem:[%s1178_s7 + $0xb0] sm:$0xff]  ;;  %v475_v15 = vld [vmem:[%s1178_s7 + $0xb8] sm:$0xff] }
  0x3e   :  { %639 = vmatpush1.bf16.msra.mxu1 %v638_v26  ;;  %v678_v26 = vpack.c.bf16 %v285_v23, %v283_v22  ;;  %v704_v5 = vpack.c.bf16 %v473_v3, %v472_v2  ;;  %v456_v6 = vld [vmem:[%s1178_s7 + $0x20] sm:$0xff]  ;;  %v459_v18 = vld [vmem:[%s1178_s7 + $0x38] sm:$0xff]  ;;  %v461_v24 = vld [vmem:[%s1178_s7 + $0x48] sm:$0xff] }
  0x3f   :  { %640 = vmatprep.subr.bf16.mxu1 %v818_v17  ;;  %v706_v8 = vpack.c.bf16 %v457_v7, %v456_v6  ;;  %v460_v23 = vld [vmem:[%s1178_s7 + $0x40] sm:$0xff]  ;;  %v481_v33 = vld [vmem:[%s1178_s7 + $0xe8] sm:$0xff]  ;;  %v466_v42 = vld [vmem:[%s1178_s7 + $0x70] sm:$0xff] }
  0x40   :  { %v714_v25 = vpack.c.bf16 %v461_v24, %v460_v23  ;;  %v467_v43 = vld [vmem:[%s1178_s7 + $0x78] sm:$0xff] }
  0x42   :  { %642 = vmatpush1.bf16.msra.mxu1 %v641_v29 }
  0x43   :  { %643 = vmatprep.subr.bf16.mxu1 %v818_v17 }
  0x46   :  { %645 = vmatpush1.bf16.msra.mxu1 %v644_v32 }
  0x47   :  { %646 = vmatprep.subr.bf16.mxu1 %v818_v17 }
  0x4a   :  { %648 = vmatpush1.bf16.msra.mxu1 %v647_v35  ;;  %v368_v35 = vld [vmem:[#allocation5 + $0x28] sm:$0xff] }
  0x4b   :  { %649 = vmatprep.subr.bf16.mxu1 %v818_v17 }
  0x4e   :  { %651 = vmatpush1.bf16.msra.mxu1 %v650_v38  ;;  %v684_v38 = vpack.c.bf16 %v370_v36, %v368_v35  ;;  %v464_v36 = vld [vmem:[%s1178_s7 + $0x60] sm:$0xff] }
  0x4f   :  { %652 = vmatprep.subr.bf16.mxu1 %v818_v17 }
  0x52   :  { %654 = vmatpush1.bf16.msra.mxu1 %v653_v41 }
  0x53   :  { %655 = vmatprep.subr.bf16.mxu1 %v818_v17 }
  0x56   :  { %657 = vmatpush1.bf16.msra.mxu1 %v656_v44  ;;  %v686_v44 = vpack.c.bf16 %v369_v40, %v367_v39  ;;  %v482_v39 = vld [vmem:[%s1178_s7 + $0xf0] sm:$0xff]  ;;  %v483_v40 = vld [vmem:[%s1178_s7 + $0xf8] sm:$0xff] }
  0x57   :  { %658 = vmatprep.subr.bf16.mxu1 %v818_v17 }
  0x5a   :  { %660 = vmatpush1.bf16.msra.mxu1 %v659_v47  ;;  %v373_v47 = vld [vmem:[#allocation5 + $0x50] sm:$0xff] }
  0x5b   :  { %661 = vmatprep.subr.bf16.mxu1 %v818_v17  ;;  %v281_v17 = vld [vmem:[%s1176_s5 + $0x50] sm:$0xff] }
  0x5c   :  { %v674_v20 = vpack.c.bf16 %v281_v17, %v279_v16  ;;  %v708_v16 = vpack.c.bf16 %v475_v15, %v474_v14  ;;  %v458_v17 = vld [vmem:[%s1178_s7 + $0x30] sm:$0xff] }
  0x5d   :  { %v710_v19 = vpack.c.bf16 %v459_v18, %v458_v17 }
  0x5e   :  { %663 = vmatpush1.bf16.msra.mxu1 %v662_v50  ;;  %675 = vmatpush1.bf16.msra.mxu0 %v674_v20  ;;  %v690_v50 = vpack.c.bf16 %v373_v47, %v371_v46  ;;  %v476_v20 = vld [vmem:[%s1178_s7 + $0xc0] sm:$0xff] }
  0x5f   :  { %677 = vmatprep.subr.bf16.mxu0 %v676_v21  ;;  %v477_v21 = vld [vmem:[%s1178_s7 + $0xc8] sm:$0xff] }
  0x60   :  { %v712_v22 = vpack.c.bf16 %v477_v21, %v476_v20 }
  0x62   :  { %679 = vmatpush1.bf16.msra.mxu0 %v678_v26  ;;  %v478_v26 = vld [vmem:[%s1178_s7 + $0xd0] sm:$0xff] }
  0x63   :  { %681 = vmatprep.subr.bf16.mxu0 %v680_v27  ;;  %v479_v27 = vld [vmem:[%s1178_s7 + $0xd8] sm:$0xff] }
 0x104   :  { %v147_v58 = vpop.f32.mrb[0].mxu1 }
 0x105   :  { %v148_v59 = vadd.f32 %v147_v58, %v70_v56  ;;  %v149_v60 = vpop.f32.mrb[1].mxu1  ;;  %v453_v58 = vld [vmem:[%s1178_s7 + $0x8] sm:$0xff] }
 0x106   :  { %v150_v61 = vadd.f32 %v149_v60, %v74_v57  ;;  %v452_v57 = vld [vmem:[%s1178_s7] sm:$0xff]  ;;  %v471_v60 = vld [vmem:[%s1178_s7 + $0x98] sm:$0xff] }
 0x107   :  { %v152_v63 = vmax.f32 %v148_v59, 0.0  ;;  %v470_v59 = vld [vmem:[%s1178_s7 + $0x90] sm:$0xff] }
 0x108   :  { %v153_v62 = vmax.f32 %v150_v61, 0.0  ;;  %v698_v61 = vpack.c.bf16 %v453_v58, %v452_v57 }
 0x10a   :  { %582 = vmatprep.mubr.msk.f32.mxu1 %vm185_vm1, %v153_v62  ;;  %v700_v62 = vpack.c.bf16 %v471_v60, %v470_v59 }
 0x10b   :  { %254 = vmatmul.mubr.f32.vlgmr.msra.gmra.mrb[2].mxu1 %v152_v63  ;;  %v454_v63 = vld [vmem:[%s1178_s7 + $0x10] sm:$0xff] }
 0x10c   :  { %v702_v4 = vpack.c.bf16 %v455_v1, %v454_v63 }
 0x1de   :  { %v255_v29 = vpop.f32.mrb[2].mxu1 }
 0x1df   :  { %v1051_v30 = vadd.f32 %v581_v28, %v255_v29  ;;  %v257_v31 = vpop.f32.mrb[3].mxu1  ;;  %v462_v28 = vld [vmem:[%s1178_s7 + $0x50] sm:$0xff]  ;;  %v716_v29 = vpack.c.bf16 %v479_v27, %v478_v26 }
 0x1e0   :  { %v463_v31 = vld [vmem:[%s1178_s7 + $0x58] sm:$0xff] }
 0x1e1   :  { %288 = vrot.lane.b32.xlu0 %v1051_v30, %s819_s1  ;;  %v260_v32 = vsel %vm259_vm2, %v1051_v30, -inf  ;;  %v718_v34 = vpack.c.bf16 %v463_v31, %v462_v28 }
 0x200   :  { %261 = vmax.xlane.f32.xlu0 %v260_v32  ;;  %v480_v32 = vld [vmem:[%s1178_s7 + $0xe0] sm:$0xff] }
 0x201   :  { %v720_v35 = vpack.c.bf16 %v481_v33, %v480_v32 }
 0x253   :  { %v289_v41 = vpop.permute.xlu0 %288 }
 0x254   :  { %583 = vmatmul.mubr.msk.f32.vlgmr.msra.gmra.mrb[0].mxu0 %vm185_vm1, %v289_v41 }
 0x255   :  { %683 = vmatpush1.bf16.msra.mxu0 %v682_v37  ;;  %443 = vmatprep.mubr.f32.mxu0 %v817_v0  ;;  %v469_v0 = vld [vmem:[%s1178_s7 + $0x88] sm:$0xff] }
 0x256   :  { %685 = vmatprep.subr.bf16.mxu0 %v684_v38  ;;  %v696_v56 = vpack.c.bf16 %v469_v0, %v468_v54  ;;  %v465_v37 = vld [vmem:[%s1178_s7 + $0x68] sm:$0xff]  ;;  %s821_s7 = smov [#allocation7]  }
 0x257   :  { %v722_v38 = vpack.c.bf16 %v465_v37, %v464_v36  ;;  %s570_s11 = sshll.u32 %s821_s7, 4  ;;  %s571_s11 = int_to_ptr.vmem [resolvable:$true] %s570_s11 }
 0x258   :  { %s785_s12 = scalar_lea.vmem %s571_s11, 128  ;;  %p790_p3 = scmp.lt.s32.totalorder %s571_s11, %s571_s11 }
 0x259   :  { %687 = vmatpush1.bf16.msra.mxu0 %v686_v44  ;;  %v726_v44 = vpack.c.bf16 %v467_v43, %v466_v42  ;;  %p786_p2 = scmp.ne.s32.totalorder %s571_s11, %s785_s12  ;;  %p791_p4 = scmp.lt.s32.totalorder %s785_s12, %s785_s12 }
 0x25a   :  { %689 = vmatprep.subr.bf16.mxu0 %v688_v45 }
 0x25b   :  { %p792_p5 = por %p791_p4, %p790_p3 }
 0x25d   :  { %691 = vmatpush1.bf16.msra.mxu0 %v690_v50  ;;  %p793_p6 = pnand %p792_p5, %p786_p2 }
 0x25e   :  { %693 = vmatprep.subr.bf16.mxu0 %v692_v51 }
 0x261   :  { %695 = vmatpush1.bf16.msra.mxu0 %v694_v55 }
 0x262   :  { %697 = vmatprep.subr.bf16.mxu0 %v696_v56 }
 0x264   :  { %584 = vmatmul.mubr.msk.f32.vlgmr.msra.gmra.mrb[2].mxu0 %vm185_vm1, %v289_v41  ;;  %v724_v41 = vpack.c.bf16 %v483_v40, %v482_v39 }
 0x265   :  { %699 = vmatpush3.bf16.msra.mxu0 %v698_v61 }
 0x266   :  { %701 = vmatprep.subr.bf16.mxu0 %v700_v62 }
 0x269   :  { %703 = vmatpush3.bf16.msra.mxu0 %v702_v4 }
 0x26a   :  { %705 = vmatprep.subr.bf16.mxu0 %v704_v5 }
 0x26d   :  { %707 = vmatpush3.bf16.msra.mxu0 %v706_v8 }
 0x26e   :  { %709 = vmatprep.subr.bf16.mxu0 %v708_v16 }
 0x271   :  { %711 = vmatpush3.bf16.msra.mxu0 %v710_v19 }
 0x272   :  { %713 = vmatprep.subr.bf16.mxu0 %v712_v22 }
 0x275   :  { %715 = vmatpush3.bf16.msra.mxu0 %v714_v25 }
 0x276   :  { %717 = vmatprep.subr.bf16.mxu0 %v716_v29 }
 0x279   :  { %719 = vmatpush3.bf16.msra.mxu0 %v718_v34 }
 0x27a   :  { %721 = vmatprep.subr.bf16.mxu0 %v720_v35 }
 0x27d   :  { %723 = vmatpush3.bf16.msra.mxu0 %v722_v38 }
 0x27e   :  { %725 = vmatprep.subr.bf16.mxu0 %v724_v41 }
 0x281   :  { %727 = vmatpush3.bf16.msra.mxu0 %v726_v44 }
 0x28d   :  { %v262_v9 = vpop.xlane.xlu0 %261 }
 0x28e   :  { %v263_v10 = vsub.f32 %v1051_v30, %v262_v9 }
 0x290   :  { %v264_v11 = vmul.f32 1.442695, %v263_v10 }
 0x292   :  { %737 = vpow2.f32 %v264_v11 }
 0x29c   :  { %v738_v12 = vpop.eup %737 }
 0x29d   :  { %v266_v13 = vsel %vm259_vm2, %v738_v12, 0.0 }
 0x29e   :  { %267 = vadd.xlane.f32.xlu1 %v266_v13 }
 0x327   :  { %v358_v45 = vpop.f32.mrb[0].mxu0 }
 0x328   :  { %v360_v46 = vpop.f32.mrb[1].mxu0 }
 0x32b   :  { %v268_v54 = vpop.xlane.xlu1 %267 }
 0x32c   :  { %739 = vrcp.f32 %v268_v54 }
 0x336   :  { %v740_v0 = vpop.eup %739 }
 0x337   :  { %v445_v47 = vpop.f32.mrb[2].mxu0  ;;  %v270_v55 = vmul.f32 %v740_v0, %v738_v12 }
 0x338   :  { %v450_v48 = vmul.f32 %v445_v47, %v358_v45  ;;  %v447_v49 = vpop.f32.mrb[3].mxu0 }
 0x339   :  { %v451_v50 = vmul.f32 %v447_v49, %v360_v46 }
 0x33b   :  { %548 = vmatprep.mubr.f32.mxu0 %v451_v50 }
 0x33c   :  { %549 = vmatmul.mubr.f32.vlgmr.msra.gmra.mrb[4].mxu0 %v450_v48 }
 0x40f   :  { %v617_v51 = vpop.f32.mrb[4].mxu0 }
 0x410   :  { %v618_v52 = vpop.f32.mrb[5].mxu0 }
 0x411   :  { %v619_v53 = vadd.f32 %v618_v52, %v617_v51 }
 0x413   :  { %555 = vrot.lane.b32.xlu1 %v619_v53, %s820_s10 }
 0x485   :  { %v556_v56 = vpop.permute.xlu1 %555 }
 0x486   :  { %v558_v57 = vsel %vm259_vm2, %v270_v55, %v556_v56 }
 0x487   :  { %v560_v58 = vsel %vm559_vm3, %v558_v57, %v1051_v30 }
 0x488   :  { %v562_v59 = vsel %vm561_vm4, %v560_v58, 0.0 }
 0x489   :  { %563 = vst [vmem:[#allocation7] sm:$0xff] %v562_v59 }
 0x48a   :  { %796 = shalt.err (!%p793_p6)
}
 0x48b   :  { %s797_s6 = scalar_lea.hbm %s1179_s8, 128 }
 0x48c   :  { %p798_p7 = scmp.ne.s32.totalorder %s1179_s8, %s797_s6  ;;  %p801_p8 = scmp.lt.u32.totalorder %s797_s6, %s1179_s8 }
 0x48e   :  { %p803_p9 = pnand %p801_p8, %p798_p7 }
 0x490   :  { %806 = shalt.err (!%p803_p9)
}
 0x491   :  { %573 = dma.vmem_to_hbm [thread:$0]  %s571_s11, 128, %s1179_s8, [#allocation4]  }
 0x492   :  { %811 = dma.done.wait [#allocation4], 128  }
 0x493   :  { %812 = vsyncadd [#allocation4], 4294967168 }
 0x494   :  { %577 = vsyncpa [#allocation3], 1 }
 0x495   :  { %578 = vsyncpa [#allocation6], 1 }
 0x496   :  { %579 = vsyncpa [#allocation4], 1 }

</bundles_post_ra>
